<compile_context>
chip_gen: v5e
topology: v5e:2x2
jax: 0.10.0
libtpu: 0.0.40
codegen_flags: <defaults>
</compile_context>

<pallas_src>
import jax
import jax.numpy as jnp
from jax.experimental import pallas as pl
from jax.experimental.pallas import tpu as pltpu

_LANE = 128


# ----------------------------- helpers --------------------------------------
def _sublane_align(dtype) -> int:
    """Preferred row alignment: 8 for 4-byte, 16 for 2-byte, 32 for 1-byte dtypes."""
    itemsize = jnp.dtype(dtype).itemsize
    return max(8, 32 // max(1, itemsize))


def _vmem_capacity_bytes() -> int:
    """Physical VMEM per TensorCore (128 MiB v5e/v6e, 64 MiB v7x)."""
    try:
        info = pltpu.get_tpu_info()
        cap = getattr(info, "vmem_capacity_bytes", None)
        if cap:
            return int(cap)
    except Exception:
        pass
    try:
        kind = jax.devices()[0].device_kind.lower()
        if "v7" in kind or "7x" in kind:
            return 64 * 1024 * 1024
    except Exception:
        pass
    return 128 * 1024 * 1024  # v5e / v6e


def _round_down(x: int, m: int) -> int:
    return (x // m) * m


def _pick_block_b(B: int, rows_cap: int, align: int) -> int:
    """Row-tile size: the full dim if it fits, else a multiple of align (>=8)."""
    rows_cap = max(1, rows_cap)
    if B <= rows_cap:
        return B                       # full-dim block bypasses the 8-sublane rule
    if rows_cap < 8:
        return min(B, 8)
    m = align if rows_cap >= align else 8
    return max(8, _round_down(rows_cap, m))


# ----------------------------- kernels --------------------------------------
def _tf_norm_kernel(tf_ref, out_ref):
    """Single pass: whole vocab row resident; one reciprocal per row.

    Row sum accumulates in f32; the broadcast multiply stays in the output
    dtype so bf16 inputs never materialize a full f32 tile.
    """
    tf = tf_ref[...]
    inv = pl.reciprocal(jnp.sum(tf, axis=1, keepdims=True, dtype=jnp.float32))
    out_ref[...] = tf.astype(out_ref.dtype) * inv.astype(out_ref.dtype)


def _make_fused_vtile_kernel(V: int, block_v: int, nv: int):
    """Fused two-phase kernel for the V-tiled fallback (grid = (nb, 2, nv)).

    Phase 0 (p == 0): accumulate row sums over V tiles into VMEM scratch,
                      convert to reciprocal on the last tile.
    Phase 1 (p == 1): rescale each V tile with the in-VMEM reciprocal.
    """
    ragged_v = (V % block_v) != 0

    def kernel(tf_ref, out_ref, acc_ref):
        p = pl.program_id(1)
        j = pl.program_id(2)

        @pl.when(jnp.logical_and(p == 0, j == 0))
        def _():
            acc_ref[...] = jnp.zeros_like(acc_ref)

        @pl.when(p == 0)
        def _():
            tf = tf_ref[...]
            if ragged_v:
                # Mask the padded tail of the last V tile so garbage columns
                # cannot contaminate the row sums.
                col = jax.lax.broadcasted_iota(jnp.int32, tf.shape, 1)
                tf = jnp.where(j * block_v + col < V, tf, jnp.zeros_like(tf))
            acc_ref[...] += jnp.sum(tf, axis=1, keepdims=True, dtype=jnp.float32)

        @pl.when(jnp.logical_and(p == 0, j == nv - 1))
        def _():
            acc_ref[...] = pl.reciprocal(acc_ref[...])

        @pl.when(p == 1)
        def _():
            inv = acc_ref[...].astype(out_ref.dtype)
            out_ref[...] = tf_ref[...].astype(out_ref.dtype) * inv

    return kernel


# ----------------------------- wrapper --------------------------------------
def tf_weights(tf, *, block_b=None, block_v=None, vmem_budget_bytes=None):
    """Row-normalize a (B, V) term-frequency matrix: tf / tf.sum(axis=1, keepdims=True)."""
    B, V = tf.shape
    in_item = jnp.dtype(tf.dtype).itemsize
    out_dtype = tf.dtype if jnp.issubdtype(tf.dtype, jnp.floating) else jnp.float32
    out_item = jnp.dtype(out_dtype).itemsize
    align = _sublane_align(tf.dtype)

    cap = _vmem_capacity_bytes()
    if vmem_budget_bytes is None:
        vmem_budget_bytes = cap // 2  # headroom for compiler temps / reduce intermediates
    vmem_limit = int(cap * 3 // 4)    # above the 16/32 MiB default, still leaves headroom

    # Double-buffered input + output tiles; no whole-tile f32 working copy anymore.
    per_elem_bytes = 2 * (in_item + out_item)

    def rows_that_fit(cols):
        return vmem_budget_bytes // max(1, cols * per_elem_bytes)

    # --- choose the vocab tile -------------------------------------------------
    if block_v is None:
        if rows_that_fit(V) >= min(8, B):
            block_v = V                               # full-vocab tile: single pass
        else:
            # V-tiled fused path: lane-aligned tile leaving room for a ~64-row strip.
            cols_budget = vmem_budget_bytes // max(1, 64 * per_elem_bytes)
            block_v = max(_LANE, _round_down(cols_budget, _LANE))
            block_v = min(block_v, max(_LANE, _round_down(V, _LANE)))
    block_v = min(int(block_v), V)
    if block_v != V and block_v % _LANE != 0:
        block_v = max(_LANE, _round_down(block_v, _LANE))
        if block_v >= V:
            block_v = V

    # --- choose the row tile ---------------------------------------------------
    rows_cap = rows_that_fit(block_v)
    target_rows = min(max(1, rows_cap), 1024)  # 512-1024 rows ~ HBM roofline
    if B >= 512:
        # Enough grid steps for DMA overlap and both v7x TensorCores (aim nb>=4..8),
        # but never shrink tiles below ~256 rows.
        target_rows = min(target_rows, max(256, pl.cdiv(B, 8)))
    if block_b is None:
        block_b = _pick_block_b(B, min(rows_cap, target_rows), align)
    block_b = min(int(block_b), B)
    if block_b != B and block_b % 8 != 0:
        block_b = max(8, _round_down(block_b, 8))
        if block_b >= B:
            block_b = B

    nb = pl.cdiv(B, block_b)
    nv = pl.cdiv(V, block_v)

    if nv == 1:
        # ---------------- single pass: full vocab per tile ----------------
        return pl.pallas_call(
            _tf_norm_kernel,
            out_shape=jax.ShapeDtypeStruct((B, V), out_dtype),
            grid_spec=pltpu.PrefetchScalarGridSpec(
                num_scalar_prefetch=0,
                grid=(nb,),
                in_specs=[pl.BlockSpec((block_b, V), lambda i: (i, 0))],
                out_specs=pl.BlockSpec((block_b, V), lambda i: (i, 0)),
            ),
            compiler_params=pltpu.CompilerParams(
                dimension_semantics=("parallel",),
                vmem_limit_bytes=vmem_limit,
            ),
            cost_estimate=pl.CostEstimate(
                flops=2 * B * V,
                transcendentals=B,
                bytes_accessed=B * V * (in_item + out_item),
            ),
        )(tf)

    # ---------------- fused two-phase, vocab-tiled for large V ----------------
    # Output index map holds block (i, 0) during phase 0 (never written there),
    # so nothing is flushed to HBM until phase 1 has produced real data; avoids
    # the garbage/double writeback a plain (i, j) map would incur.
    kernel = _make_fused_vtile_kernel(V, block_v, nv)
    return pl.pallas_call(
        kernel,
        out_shape=jax.ShapeDtypeStruct((B, V), out_dtype),
        grid_spec=pltpu.PrefetchScalarGridSpec(
            num_scalar_prefetch=0,
            grid=(nb, 2, nv),
            in_specs=[pl.BlockSpec((block_b, block_v), lambda i, p, j: (i, j))],
            out_specs=pl.BlockSpec((block_b, block_v), lambda i, p, j: (i, p * j)),
            scratch_shapes=[pltpu.VMEM((block_b, 1), jnp.float32)],
        ),
        compiler_params=pltpu.CompilerParams(
            dimension_semantics=("parallel", "arbitrary", "arbitrary"),
            vmem_limit_bytes=vmem_limit,
        ),
        cost_estimate=pl.CostEstimate(
            flops=2 * B * V,
            transcendentals=B,
            bytes_accessed=B * V * (2 * in_item + out_item),
        ),
    )(tf)


class TfWeightsPallas:
    """JAX/Pallas port of TfWeights(WeightingScheme)."""

    def __init__(self, voc=None, to_device=None):
        self.voc = voc
        self.to_device = to_device if to_device is not None else (lambda x: x)

    def __call__(self, indices, w_es, instance):
        # `indices` and `w_es` are unused by TfWeights, mirroring the PyTorch module.
        tf = self.to_device(instance["tf"])
        return tf_weights(tf)


if __name__ == "__main__":
    key = jax.random.PRNGKey(0)
    k1, k2 = jax.random.split(key, 2)

    def ref_norm(x):
        xf = x.astype(jnp.float32)
        out = xf / jnp.sum(xf, axis=1, keepdims=True)
        return out

    # (1) typical case: full-vocab single-pass path via the module wrapper.
    B, V = 16, 256
    counts = jax.random.randint(k1, (B, V), minval=0, maxval=10).astype(jnp.float32)
    counts = counts + 0.5  # strictly positive row sums (typical tf inputs)
    ref = ref_norm(counts)

    model = TfWeightsPallas(voc=None, to_device=lambda x: x)
    out = jax.block_until_ready(model(indices=None, w_es=None, instance={"tf": counts}))
    assert out.shape == (B, V) and out.dtype == counts.dtype
    assert jnp.allclose(out, ref, atol=1e-6, rtol=1e-6)
    assert jnp.allclose(jnp.sum(out, axis=1), jnp.ones((B,)), atol=1e-5)

    # (2) fused vocab-tiled two-phase path (selected automatically for huge V; forced here).
    out2 = jax.block_until_ready(tf_weights(counts, block_v=128))
    assert jnp.allclose(out2, ref, atol=1e-6, rtol=1e-6)
    assert jnp.allclose(jnp.sum(out2, axis=1), jnp.ones((B,)), atol=1e-5)

    # (3) ragged batch tile (cdiv grid) + vocab not a multiple of 128 (full-V tile).
    B3, V3 = 20, 200
    c3 = jax.random.uniform(k2, (B3, V3), minval=0.1, maxval=1.0, dtype=jnp.float32)
    ref3 = ref_norm(c3)
    out3 = jax.block_until_ready(tf_weights(c3, block_b=16))
    assert jnp.allclose(out3, ref3, atol=1e-6, rtol=1e-6)

    # (4) fused path with ragged last V tile (masked phase-0 sum) + ragged B tile.
    out4 = jax.block_until_ready(tf_weights(c3, block_b=16, block_v=128))
    assert jnp.allclose(out4, ref3, atol=1e-6, rtol=1e-6)

    # (5) bf16 path: sum accumulates in f32, multiply stays bf16 (no f32 tile copy).
    cb = counts.astype(jnp.bfloat16)
    out5 = jax.block_until_ready(tf_weights(cb))
    assert out5.dtype == jnp.bfloat16
    assert jnp.allclose(out5.astype(jnp.float32), ref, atol=2e-2, rtol=2e-2)

    print("KERNEL_OK")
</pallas_src>

<mosaic_0001>
module attributes {stable_mosaic.version = 11 : i64} {
  func.func @_tf_norm_kernel(%arg0: i32, %arg1: memref<16x256xf32, #tpu.memory_space<vmem>>, %arg2: memref<16x256xf32, #tpu.memory_space<vmem>>) attributes {dimension_semantics = [#tpu.dimension_semantics<parallel>], iteration_bounds = array<i64: 1>, scalar_prefetch = 0 : i64, scratch_operands = 0 : i64, tpu.core_type = #tpu.core_type<tc>, window_params = [{transform_indices = @transform_0, window_bounds = array<i64: 16, 256>}, {transform_indices = @transform_1, window_bounds = array<i64: 16, 256>}]} {
    %c0 = arith.constant 0 : index
    %c0_0 = arith.constant 0 : index
    %0 = vector.load %arg1[%c0, %c0_0] : memref<16x256xf32, #tpu.memory_space<vmem>>, vector<16x256xf32>
    %cst = arith.constant dense<0.000000e+00> : vector<16xf32>
    %1 = vector.multi_reduction <add>, %0, %cst [1] : vector<16x256xf32> to vector<16xf32>
    %2 = vector.shape_cast %1 : vector<16xf32> to vector<16x1xf32>
    %3 = tpu.reciprocal %2 : vector<16x1xf32> -> vector<16x1xf32>
    %4 = vector.broadcast %3 : vector<16x1xf32> to vector<16x256xf32>
    %5 = arith.mulf %0, %4 : vector<16x256xf32>
    %c0_1 = arith.constant 0 : index
    %c0_2 = arith.constant 0 : index
    %6 = vector.load %arg2[%c0_1, %c0_2] : memref<16x256xf32, #tpu.memory_space<vmem>>, vector<16x256xf32>
    tpu.vector_store %arg2[%c0_1, %c0_2], %5 {strides = array<i32>} : memref<16x256xf32, #tpu.memory_space<vmem>>, vector<16x256xf32>,
    return
  }
  func.func @transform_0(%arg0: i32) -> (i32, i32) {
    %c0_i32 = arith.constant 0 : i32
    %c0_i32_0 = arith.constant 0 : i32
    return %arg0, %c0_i32 : i32, i32
  }
  func.func @transform_1(%arg0: i32) -> (i32, i32) {
    %c0_i32 = arith.constant 0 : i32
    %c0_i32_0 = arith.constant 0 : i32
    return %arg0, %c0_i32 : i32, i32
  }
}

</mosaic_0001>

<bundles_post_ra>
// kernel: tpu_custom_call.1
= control target key start
LH: loop header
LB: loop body
LE: loop exit
PB: predicated region body
PF: predicated region fallthrough
CT: control target
= control target key end

     0   :  { %6 = vsyncpa [#allocation3], 0  ;;  %s176_s0 = inlined_call_operand.hbm [shape: f32[16,256], index: 0, kind: input, shape index: {}]   ;;  %s177_s1 = inlined_call_operand.hbm [shape: f32[16,256], index: 1, kind: output, shape index: {}]  }
   0x1   :  { %7 = vsyncpa [#allocation4], 0  ;;  %s12_s8 = sshll.u32 %s176_s0, 4  ;;  %s150_s9 = smov [#allocation2]   ;;  %s13_s8 = int_to_ptr.hbm [resolvable:$true] %s12_s8 }
   0x2   :  { %s14_s10 = sshll.u32 %s150_s9, 4  ;;  %s151_s11 = smov 256   ;;  %s15_s10 = int_to_ptr.vmem [resolvable:$true] %s14_s10 }
   0x3   :  { %s152_s12 = smov 16  }
   0x4   :  { %20 = dma.hbm_to_vmem [thread:$0]  %s13_s8, 512, %s15_s10, [#allocation3], %s151_s11, %s151_s11, %s152_s12  }
   0x5   :  { %146 = dma.done.wait [#allocation3], 512  }
   0x6   :  { %147 = vsyncadd [#allocation3], 4294966784  ;;  %v25_v0 = vld [vmem:[#allocation2] sm:$0xff]  ;;  %v26_v1 = vld [vmem:[#allocation2 + $0x8] sm:$0xff]  ;;  %s153_s0 = smov [#allocation5]   ;;  %s77_s16 = sshll.u32 %s177_s1, 4  ;;  %s78_s16 = int_to_ptr.hbm [resolvable:$true] %s77_s16 }
   0x7   :  { %v29_v2 = vadd.f32 %v26_v1, %v25_v0  ;;  %v27_v3 = vld [vmem:[#allocation2 + $0x10] sm:$0xff]  ;;  %v28_v4 = vld [vmem:[#allocation2 + $0x18] sm:$0xff]  ;;  %s75_s13 = sshll.u32 %s153_s0, 4  ;;  %s76_s13 = int_to_ptr.vmem [resolvable:$true] %s75_s13 }
   0x8   :  { %v32_v5 = vadd.f32 %v28_v4, %v27_v3 }
   0x9   :  { %30 = vadd.xlane.f32.xlu0 %v29_v2 }
  0x11   :  { %33 = vadd.xlane.f32.xlu0 %v32_v5 }
  0x7c   :  { %v31_v6 = vpop.xlane.xlu0 %30 }
  0x7d   :  { %94 = vrcp.f32 %v31_v6  ;;  %v46_v11 = vand.u32 2147483648, %v31_v6  ;;  %v44_v13 = vand.u32 2147483647, %v31_v6  ;;  %vm40_vm1 = vweird.f32 %v31_v6 }
  0x7f   :  { %v47_v16 = vor.u32 1.1754944e-38, %v46_v11  ;;  %vm45_vm3 = vcmp.eq.f32.partialorder %v44_v13, 8.507059e+37 }
  0x83   :  { %v95_v7 = vpop.eup %94 }
  0x84   :  { %v36_v8 = vmul.f32 %v95_v7, %v31_v6  ;;  %v34_v9 = vpop.xlane.xlu0 %33  ;;  %vm41_vm0 = vweird.f32 %v95_v7 }
  0x85   :  { %96 = vrcp.f32 %v34_v9  ;;  %vm42_vm2 = vmor %vm40_vm1, %vm41_vm0  ;;  %v60_v23 = vand.u32 2147483648, %v34_v9  ;;  %v58_v25 = vand.u32 2147483647, %v34_v9  ;;  %vm54_vm5 = vweird.f32 %v34_v9 }
  0x86   :  { %v37_v10 = vsub.f32 1.0, %v36_v8 }
  0x87   :  { %v61_v27 = vor.u32 1.1754944e-38, %v60_v23  ;;  %vm59_vm7 = vcmp.eq.f32.partialorder %v58_v25, 8.507059e+37 }
  0x88   :  { %v38_v12 = vmul.f32 %v95_v7, %v37_v10 }
  0x8a   :  { %v39_v14 = vadd.f32 %v95_v7, %v38_v12 }
  0x8b   :  { %v97_v15 = vpop.eup %96 }
  0x8c   :  { %v43_v17 = vsel %vm42_vm2, %v95_v7, %v39_v14  ;;  %v50_v18 = vmul.f32 %v97_v15, %v34_v9  ;;  %vm55_vm4 = vweird.f32 %v97_v15 }
  0x8d   :  { %v48_v19 = vsel %vm45_vm3, %v47_v16, %v43_v17  ;;  %vm56_vm6 = vmor %vm54_vm5, %vm55_vm4 }
  0x8e   :  { %v63_v20 = vmul.f32 %v48_v19, %v25_v0  ;;  %v64_v21 = vmul.f32 %v48_v19, %v26_v1  ;;  %v51_v22 = vsub.f32 1.0, %v50_v18 }
  0x90   :  { %67 = vst [vmem:[#allocation5] sm:$0xff] %v63_v20  ;;  %v52_v24 = vmul.f32 %v97_v15, %v51_v22 }
  0x91   :  { %68 = vst [vmem:[#allocation5 + $0x8] sm:$0xff] %v64_v21 }
  0x92   :  { %v53_v26 = vadd.f32 %v97_v15, %v52_v24 }
  0x94   :  { %v57_v28 = vsel %vm56_vm6, %v97_v15, %v53_v26 }
  0x95   :  { %v62_v29 = vsel %vm59_vm7, %v61_v27, %v57_v28 }
  0x96   :  { %v65_v30 = vmul.f32 %v62_v29, %v27_v3  ;;  %v66_v31 = vmul.f32 %v62_v29, %v28_v4 }
  0x98   :  { %69 = vst [vmem:[#allocation5 + $0x10] sm:$0xff] %v65_v30 }
  0x99   :  { %70 = vst [vmem:[#allocation5 + $0x18] sm:$0xff] %v66_v31 }
  0x9a   :  { %83 = dma.vmem_to_hbm [thread:$0]  %s76_s13, 512, %s78_s16, [#allocation4], %s151_s11, %s151_s11, %s152_s12  }
  0x9b   :  { %148 = dma.done.wait [#allocation4], 512  }
  0x9c   :  { %149 = vsyncadd [#allocation4], 4294966784 }
  0x9d   :  { %88 = vsyncpa [#allocation3], 1 }
  0x9e   :  { %89 = vsyncpa [#allocation4], 1 }

</bundles_post_ra>
